<compile_context>
chip_gen: v7x
topology: tpu7x:2x2x1
jax: 0.10.0
libtpu: 0.0.40
codegen_flags: <defaults>
</compile_context>

<pallas_src>
import functools

import jax
import jax.numpy as jnp
from jax.experimental import pallas as pl
from jax.experimental.pallas import tpu as pltpu

EPS = 1e-5
LANE = 128
_SMALL_BATCH = 256  # below this, a single batch tile (per-step overhead dominates)


def _round_up(x, m):
    return ((x + m - 1) // m) * m


# ---------------------------------------------------------------------------
# Kernel
# ---------------------------------------------------------------------------
def _make_kernel(n_hidden):
    """Fused MLP kernel.

    Ref layout: x_ref, w_0 .. w_{n-1}, w_predict, hidden_biases, predict_bias, out_ref
      x_ref          : (tile_b, in_size)            bf16
      w_i            : (in_i_padded, 128)           bf16   (columns zero-padded to 128)
      w_predict      : (128, output_size)           bf16   (rows zero-padded to 128)
      hidden_biases  : (n_hidden, 128)              f32    (rows zero-padded to 128)
      predict_bias   : (1, output_size)             f32
      out_ref        : (tile_b, output_size)        f32
    """

    def kernel(x_ref, *refs):
        out_ref = refs[-1]
        bp_ref = refs[-2]
        hb_ref = refs[-3]
        wp_ref = refs[-4]
        w_refs = refs[:n_hidden]

        h = x_ref[...]                                    # bf16 (tile_b, in_size)
        for i in range(n_hidden):
            # Linear(no bias) + folded BN bias, ReLU. Dropout: identity in eval mode.
            acc = jnp.dot(h, w_refs[i][...], preferred_element_type=jnp.float32)
            h = jnp.maximum(acc + hb_ref[i:i + 1, :], 0.0).astype(x_ref.dtype)

        out_ref[...] = (
            jnp.dot(h, wp_ref[...], preferred_element_type=jnp.float32) + bp_ref[...]
        )

    return kernel


# ---------------------------------------------------------------------------
# Parameter preparation (host side)
# ---------------------------------------------------------------------------
def _fold_bn(w, gamma, beta, mean, var, eps=EPS):
    scale = gamma * jax.lax.rsqrt(var + eps)      # (1, out)
    return w * scale, beta - mean * scale          # (in, out), (1, out)


def _pad_to(a, rows, cols):
    r, c = a.shape
    return jnp.pad(a, ((0, rows - r), (0, cols - c)))


def prepare_params(raw_params, num_hidden):
    """raw_params: [W, gamma, beta, mean, var] x num_hidden, then [W_predict, b_predict].

    Returns lane-padded bf16 weights and f32 biases ready for the kernel.
    """
    folded_weights, hidden_biases = [], []
    for i in range(num_hidden):
        w, gamma, beta, mean, var = raw_params[i * 5:(i + 1) * 5]
        wf, b = _fold_bn(w, gamma, beta, mean, var)
        in_dim = wf.shape[0] if i == 0 else LANE       # layer 0 input stays at input_size
        folded_weights.append(_pad_to(wf, in_dim, LANE).astype(jnp.bfloat16))
        hidden_biases.append(_pad_to(b, 1, LANE))
    hidden_biases = jnp.concatenate(hidden_biases, axis=0).astype(jnp.float32)

    wp, bp = raw_params[-2], raw_params[-1]
    wp = _pad_to(wp, LANE, wp.shape[1]).astype(jnp.bfloat16)   # rows padded to 128
    bp = bp.astype(jnp.float32)                                # (1, output_size)
    return folded_weights, wp, hidden_biases, bp


# ---------------------------------------------------------------------------
# Forward wrapper
# ---------------------------------------------------------------------------
def model_bn_forward(x, folded_weights, wp, hidden_biases, bp, *, max_tile_b=2048):
    """x: (B, input_size). Returns (B, output_size) f32."""
    B, in_size = x.shape
    output_size = wp.shape[1]
    n_hidden = len(folded_weights)

    # bf16 activations halve the dominant HBM read (ideally x already arrives as bf16).
    x = x.astype(jnp.bfloat16)

    # Batch tiling: big tiles to amortize the ~0.35 us/step overhead, but force >= 2 tiles
    # for large batches so the 'parallel' axis shards across both TensorCores on v7x.
    if B <= _SMALL_BATCH:
        tile_b = B
    else:
        tile_b = min(max_tile_b, _round_up(pl.cdiv(B, 2), 8))
    grid = (pl.cdiv(B, tile_b),)

    kernel = _make_kernel(n_hidden)

    const_map = lambda i: (0, 0)   # weights/biases resident across batch tiles
    in_specs = (
        [pl.BlockSpec((tile_b, in_size), lambda i: (i, 0))]
        + [pl.BlockSpec(w.shape, const_map) for w in folded_weights]
        + [pl.BlockSpec(wp.shape, const_map),
           pl.BlockSpec(hidden_biases.shape, const_map),
           pl.BlockSpec(bp.shape, const_map)]
    )
    out_spec = pl.BlockSpec((tile_b, output_size), lambda i: (i, 0))

    return pl.pallas_call(
        kernel,
        out_shape=jax.ShapeDtypeStruct((B, output_size), jnp.float32),
        grid=grid,
        in_specs=in_specs,
        out_specs=out_spec,
        compiler_params=pltpu.CompilerParams(
            dimension_semantics=("parallel",)),
    )(x, *folded_weights, wp, hidden_biases, bp)


# ---------------------------------------------------------------------------
# Deterministic init mirroring the PyTorch module
# ---------------------------------------------------------------------------
def init_params(key, input_size, output_size, hidden_sizes=(10, 10, 10)):
    """Linear weights: xavier_uniform, stored as (in, out).
    BatchNorm1d: gamma=1, beta=0, running_mean=0, running_var=1.
    predict: xavier_uniform weight + default-uniform bias."""
    sizes = [input_size] + list(hidden_sizes)
    params = []
    keys = jax.random.split(key, len(sizes))
    for i in range(len(sizes) - 1):
        fan_in, fan_out = sizes[i], sizes[i + 1]
        bound = (6.0 / (fan_in + fan_out)) ** 0.5
        w = jax.random.uniform(keys[i], (fan_in, fan_out), jnp.float32, -bound, bound)
        gamma = jnp.ones((1, fan_out), jnp.float32)
        beta = jnp.zeros((1, fan_out), jnp.float32)
        r_mean = jnp.zeros((1, fan_out), jnp.float32)
        r_var = jnp.ones((1, fan_out), jnp.float32)
        params += [w, gamma, beta, r_mean, r_var]

    fan_in, fan_out = sizes[-1], output_size
    bound = (6.0 / (fan_in + fan_out)) ** 0.5
    kw, kb = jax.random.split(keys[-1])
    wp = jax.random.uniform(kw, (fan_in, fan_out), jnp.float32, -bound, bound)
    b_bound = 1.0 / (fan_in ** 0.5)
    bp = jax.random.uniform(kb, (1, fan_out), jnp.float32, -b_bound, b_bound)
    params += [wp, bp]
    return params


# ---------------------------------------------------------------------------
# Pure-JAX references
# ---------------------------------------------------------------------------
def reference_f32(x, raw_params, num_hidden):
    """Original module semantics (eval-mode BN, dropout identity), full f32."""
    h = x
    for i in range(num_hidden):
        w, gamma, beta, mean, var = raw_params[i * 5:(i + 1) * 5]
        h = h @ w
        h = (h - mean) * jax.lax.rsqrt(var + EPS) * gamma + beta
        h = jnp.maximum(h, 0.0)
    return h @ raw_params[-2] + raw_params[-1]


def reference_bf16(x, raw_params, num_hidden):
    """Same math as the kernel: bf16 inputs/weights, f32 accumulation + biases."""
    h = x.astype(jnp.bfloat16).astype(jnp.float32)
    for i in range(num_hidden):
        w, gamma, beta, mean, var = raw_params[i * 5:(i + 1) * 5]
        scale = gamma * jax.lax.rsqrt(var + EPS)
        wf = (w * scale).astype(jnp.bfloat16).astype(jnp.float32)
        b = beta - mean * scale
        h = jnp.maximum(h @ wf + b, 0.0).astype(jnp.bfloat16).astype(jnp.float32)
    wp = raw_params[-2].astype(jnp.bfloat16).astype(jnp.float32)
    return h @ wp + raw_params[-1]


if __name__ == "__main__":
    input_size = 32
    output_size = 4
    hidden_sizes = (10, 10, 10)
    batch = 8

    key = jax.random.PRNGKey(0)
    kx, kp = jax.random.split(key)
    x = jax.random.normal(kx, (batch, input_size), jnp.float32)

    raw_params = init_params(kp, input_size, output_size, hidden_sizes)
    folded_weights, wp, hidden_biases, bp = prepare_params(raw_params, len(hidden_sizes))

    out = model_bn_forward(x, folded_weights, wp, hidden_biases, bp)
    out = jax.block_until_ready(out)

    ref_tight = reference_bf16(x, raw_params, len(hidden_sizes))
    ref_loose = reference_f32(x, raw_params, len(hidden_sizes))

    assert out.shape == (batch, output_size)
    assert bool(jnp.all(jnp.isfinite(out)))
    assert jnp.allclose(out, ref_tight, atol=2e-3, rtol=2e-3), "mismatch vs bf16-matched ref"
    assert jnp.allclose(out, ref_loose, atol=5e-2, rtol=5e-2), "mismatch vs f32 semantics ref"
    print("KERNEL_OK")
</pallas_src>

<mosaic_0001>
module attributes {stable_mosaic.version = 11 : i64} {
  func.func @kernel(%arg0: i32, %arg1: memref<8x32xbf16, #tpu.memory_space<vmem>>, %arg2: memref<32x128xbf16, #tpu.memory_space<vmem>>, %arg3: memref<128x128xbf16, #tpu.memory_space<vmem>>, %arg4: memref<128x128xbf16, #tpu.memory_space<vmem>>, %arg5: memref<128x4xbf16, #tpu.memory_space<vmem>>, %arg6: memref<3x128xf32, #tpu.memory_space<vmem>>, %arg7: memref<1x4xf32, #tpu.memory_space<vmem>>, %arg8: memref<8x4xf32, #tpu.memory_space<vmem>>) attributes {dimension_semantics = [#tpu.dimension_semantics<parallel>], iteration_bounds = array<i64: 1>, scalar_prefetch = 0 : i64, scratch_operands = 0 : i64, tpu.core_type = #tpu.core_type<tc>, window_params = [{transform_indices = @transform_0, window_bounds = array<i64: 8, 32>}, {pipeline_mode = #tpu.pipeline_mode<synchronous>, transform_indices = @transform_1, window_bounds = array<i64: 32, 128>}, {pipeline_mode = #tpu.pipeline_mode<synchronous>, transform_indices = @transform_2, window_bounds = array<i64: 128, 128>}, {pipeline_mode = #tpu.pipeline_mode<synchronous>, transform_indices = @transform_3, window_bounds = array<i64: 128, 128>}, {pipeline_mode = #tpu.pipeline_mode<synchronous>, transform_indices = @transform_4, window_bounds = array<i64: 128, 4>}, {pipeline_mode = #tpu.pipeline_mode<synchronous>, transform_indices = @transform_5, window_bounds = array<i64: 3, 128>}, {pipeline_mode = #tpu.pipeline_mode<synchronous>, transform_indices = @transform_6, window_bounds = array<i64: 1, 4>}, {transform_indices = @transform_7, window_bounds = array<i64: 8, 4>}]} {
    %c0 = arith.constant 0 : index
    %c0_0 = arith.constant 0 : index
    %0 = vector.load %arg1[%c0, %c0_0] : memref<8x32xbf16, #tpu.memory_space<vmem>>, vector<8x32xbf16>
    %c0_1 = arith.constant 0 : index
    %c0_2 = arith.constant 0 : index
    %1 = vector.load %arg2[%c0_1, %c0_2] : memref<32x128xbf16, #tpu.memory_space<vmem>>, vector<32x128xbf16>
    %cst = arith.constant dense<0.000000e+00> : vector<8x128xf32>
    %2 = tpu.matmul %0, %1, %cst {dimension_numbers = #tpu.dot_dimension_numbers<[1], [0], [0], [1], [0, 0, 1, 1], [], []>} : vector<8x32xbf16>, vector<32x128xbf16>, vector<8x128xf32> -> vector<8x128xf32>
    %c0_3 = arith.constant 0 : index
    %c0_4 = arith.constant 0 : index
    %3 = vector.load %arg6[%c0_3, %c0_4] : memref<3x128xf32, #tpu.memory_space<vmem>>, vector<1x128xf32>
    %4 = vector.broadcast %3 : vector<1x128xf32> to vector<8x128xf32>
    %5 = arith.addf %2, %4 : vector<8x128xf32>
    %cst_5 = arith.constant 0.000000e+00 : f32
    %6 = vector.broadcast %cst_5 : f32 to vector<8x128xf32>
    %7 = arith.maximumf %5, %6 : vector<8x128xf32>
    %8 = arith.truncf %7 : vector<8x128xf32> to vector<8x128xbf16>
    %c0_6 = arith.constant 0 : index
    %c0_7 = arith.constant 0 : index
    %9 = vector.load %arg3[%c0_6, %c0_7] : memref<128x128xbf16, #tpu.memory_space<vmem>>, vector<128x128xbf16>
    %cst_8 = arith.constant dense<0.000000e+00> : vector<8x128xf32>
    %10 = tpu.matmul %8, %9, %cst_8 {dimension_numbers = #tpu.dot_dimension_numbers<[1], [0], [0], [1], [0, 0, 1, 1], [], []>} : vector<8x128xbf16>, vector<128x128xbf16>, vector<8x128xf32> -> vector<8x128xf32>
    %c1 = arith.constant 1 : index
    %c0_9 = arith.constant 0 : index
    %11 = vector.load %arg6[%c1, %c0_9] : memref<3x128xf32, #tpu.memory_space<vmem>>, vector<1x128xf32>
    %12 = vector.broadcast %11 : vector<1x128xf32> to vector<8x128xf32>
    %13 = arith.addf %10, %12 : vector<8x128xf32>
    %cst_10 = arith.constant 0.000000e+00 : f32
    %14 = vector.broadcast %cst_10 : f32 to vector<8x128xf32>
    %15 = arith.maximumf %13, %14 : vector<8x128xf32>
    %16 = arith.truncf %15 : vector<8x128xf32> to vector<8x128xbf16>
    %c0_11 = arith.constant 0 : index
    %c0_12 = arith.constant 0 : index
    %17 = vector.load %arg4[%c0_11, %c0_12] : memref<128x128xbf16, #tpu.memory_space<vmem>>, vector<128x128xbf16>
    %cst_13 = arith.constant dense<0.000000e+00> : vector<8x128xf32>
    %18 = tpu.matmul %16, %17, %cst_13 {dimension_numbers = #tpu.dot_dimension_numbers<[1], [0], [0], [1], [0, 0, 1, 1], [], []>} : vector<8x128xbf16>, vector<128x128xbf16>, vector<8x128xf32> -> vector<8x128xf32>
    %c2 = arith.constant 2 : index
    %c0_14 = arith.constant 0 : index
    %19 = vector.load %arg6[%c2, %c0_14] : memref<3x128xf32, #tpu.memory_space<vmem>>, vector<1x128xf32>
    %20 = vector.broadcast %19 : vector<1x128xf32> to vector<8x128xf32>
    %21 = arith.addf %18, %20 : vector<8x128xf32>
    %cst_15 = arith.constant 0.000000e+00 : f32
    %22 = vector.broadcast %cst_15 : f32 to vector<8x128xf32>
    %23 = arith.maximumf %21, %22 : vector<8x128xf32>
    %24 = arith.truncf %23 : vector<8x128xf32> to vector<8x128xbf16>
    %c0_16 = arith.constant 0 : index
    %c0_17 = arith.constant 0 : index
    %25 = vector.load %arg5[%c0_16, %c0_17] : memref<128x4xbf16, #tpu.memory_space<vmem>>, vector<128x4xbf16>
    %cst_18 = arith.constant dense<0.000000e+00> : vector<8x4xf32>
    %26 = tpu.matmul %24, %25, %cst_18 {dimension_numbers = #tpu.dot_dimension_numbers<[1], [0], [0], [1], [0, 0, 1, 1], [], []>} : vector<8x128xbf16>, vector<128x4xbf16>, vector<8x4xf32> -> vector<8x4xf32>
    %c0_19 = arith.constant 0 : index
    %c0_20 = arith.constant 0 : index
    %27 = vector.load %arg7[%c0_19, %c0_20] : memref<1x4xf32, #tpu.memory_space<vmem>>, vector<1x4xf32>
    %28 = vector.broadcast %27 : vector<1x4xf32> to vector<8x4xf32>
    %29 = arith.addf %26, %28 : vector<8x4xf32>
    %c0_21 = arith.constant 0 : index
    %c0_22 = arith.constant 0 : index
    %30 = vector.load %arg8[%c0_21, %c0_22] : memref<8x4xf32, #tpu.memory_space<vmem>>, vector<8x4xf32>
    tpu.vector_store %arg8[%c0_21, %c0_22], %29 {strides = array<i32>} : memref<8x4xf32, #tpu.memory_space<vmem>>, vector<8x4xf32>,
    return
  }
  func.func @transform_0(%arg0: i32) -> (i32, i32) {
    %c0_i32 = arith.constant 0 : i32
    %c0_i32_0 = arith.constant 0 : i32
    return %arg0, %c0_i32 : i32, i32
  }
  func.func @transform_1(%arg0: i32) -> (i32, i32) {
    %c0_i32 = arith.constant 0 : i32
    %c0_i32_0 = arith.constant 0 : i32
    %c0_i32_1 = arith.constant 0 : i32
    return %c0_i32, %c0_i32_0 : i32, i32
  }
  func.func @transform_2(%arg0: i32) -> (i32, i32) {
    %c0_i32 = arith.constant 0 : i32
    %c0_i32_0 = arith.constant 0 : i32
    %c0_i32_1 = arith.constant 0 : i32
    return %c0_i32, %c0_i32_0 : i32, i32
  }
  func.func @transform_3(%arg0: i32) -> (i32, i32) {
    %c0_i32 = arith.constant 0 : i32
    %c0_i32_0 = arith.constant 0 : i32
    %c0_i32_1 = arith.constant 0 : i32
    return %c0_i32, %c0_i32_0 : i32, i32
  }
  func.func @transform_4(%arg0: i32) -> (i32, i32) {
    %c0_i32 = arith.constant 0 : i32
    %c0_i32_0 = arith.constant 0 : i32
    %c0_i32_1 = arith.constant 0 : i32
    return %c0_i32, %c0_i32_0 : i32, i32
  }
  func.func @transform_5(%arg0: i32) -> (i32, i32) {
    %c0_i32 = arith.constant 0 : i32
    %c0_i32_0 = arith.constant 0 : i32
    %c0_i32_1 = arith.constant 0 : i32
    return %c0_i32, %c0_i32_0 : i32, i32
  }
  func.func @transform_6(%arg0: i32) -> (i32, i32) {
    %c0_i32 = arith.constant 0 : i32
    %c0_i32_0 = arith.constant 0 : i32
    %c0_i32_1 = arith.constant 0 : i32
    return %c0_i32, %c0_i32_0 : i32, i32
  }
  func.func @transform_7(%arg0: i32) -> (i32, i32) {
    %c0_i32 = arith.constant 0 : i32
    %c0_i32_0 = arith.constant 0 : i32
    return %arg0, %c0_i32 : i32, i32
  }
}

</mosaic_0001>

<bundles_post_ra>
// kernel: tpu_custom_call.1
= control target key start
LH: loop header
LB: loop body
LE: loop exit
PB: predicated region body
PF: predicated region fallthrough
CT: control target
= control target key end

     0   :  { %12 = vsyncpa [#allocation3], 0  ;;  %s843_s0 = inlined_call_operand.vmem [shape: bf16[8,32], index: 0, kind: input, shape index: {}]   ;;  %s844_s1 = inlined_call_operand.hbm [shape: bf16[32,128], index: 1, kind: input, shape index: {}]   ;;  %s845_s2 = inlined_call_operand.vmem [shape: bf16[128,128], index: 2, kind: input, shape index: {}]   ;;  %s846_s3 = inlined_call_operand.hbm [shape: bf16[128,128], index: 3, kind: input, shape index: {}]   ;;  %s847_s4 = inlined_call_operand.vmem [shape: bf16[128,4], index: 4, kind: input, shape index: {}]   ;;  %s848_s5 = inlined_call_operand.vmem [shape: f32[3,128], index: 5, kind: input, shape index: {}]   ;;  %s849_s6 = inlined_call_operand.vmem [shape: f32[1,4], index: 6, kind: input, shape index: {}]   ;;  %s850_s7 = inlined_call_operand.vmem [shape: f32[8,4], index: 7, kind: output, shape index: {}]  }
   0x1   :  { %13 = vsyncpa [#allocation5], 0  ;;  %s673_s24 = smov [#allocation2]   ;;  %s625_s28 = scalar_lea.hbm %s844_s1, 256 }
   0x2   :  { %s21_s25 = sshll.u32 %s673_s24, 4  ;;  %p626_p0 = scmp.ne.s32.totalorder %s844_s1, %s625_s28  ;;  %s22_s25 = int_to_ptr.vmem [resolvable:$true] %s21_s25 }
   0x3   :  { %p629_p1 = scmp.lt.u32.totalorder %s625_s28, %s844_s1 }
   0x5   :  { %p631_p2 = pnand %p629_p1, %p626_p0 }
   0x7   :  { %634 = shalt.err (!%p631_p2)
}
   0x8   :  { %s635_s10 = scalar_lea.vmem %s22_s25, 256  ;;  %p640_p4 = scmp.lt.s32.totalorder %s22_s25, %s22_s25 }
   0x9   :  { %p636_p3 = scmp.ne.s32.totalorder %s22_s25, %s635_s10  ;;  %p641_p5 = scmp.lt.s32.totalorder %s635_s10, %s635_s10 }
   0xb   :  { %p642_p6 = por %p641_p5, %p640_p4 }
   0xd   :  { %p643_p7 = pnand %p642_p6, %p636_p3 }
   0xf   :  { %646 = shalt.err (!%p643_p7)
}
  0x10   :  { %s674_s11 = smov 64   ;;  %s675_s12 = smov 4  }
  0x11   :  { %27 = dma.hbm_to_vmem [thread:$0]  %s844_s1, 256, %s22_s25, [#allocation3], %s674_s11, %s674_s11, %s675_s12  }
  0x12   :  { %s676_s15 = smov [#allocation4]   ;;  %s647_s19 = scalar_lea.hbm %s846_s3, 1024 }
  0x13   :  { %s35_s16 = sshll.u32 %s676_s15, 4  ;;  %p648_p8 = scmp.ne.s32.totalorder %s846_s3, %s647_s19  ;;  %s36_s16 = int_to_ptr.vmem [resolvable:$true] %s35_s16 }
  0x14   :  { %p651_p9 = scmp.lt.u32.totalorder %s647_s19, %s846_s3 }
  0x16   :  { %p653_p10 = pnand %p651_p9, %p648_p8 }
  0x18   :  { %656 = shalt.err (!%p653_p10)
}
  0x19   :  { %s657_s24 = scalar_lea.vmem %s36_s16, 1024  ;;  %p662_p12 = scmp.lt.s32.totalorder %s36_s16, %s36_s16 }
  0x1a   :  { %p658_p11 = scmp.ne.s32.totalorder %s36_s16, %s657_s24  ;;  %p663_p13 = scmp.lt.s32.totalorder %s657_s24, %s657_s24 }
  0x1c   :  { %p664_p0 = por %p663_p13, %p662_p12 }
  0x1e   :  { %p665_p1 = pnand %p664_p0, %p658_p11 }
  0x20   :  { %668 = shalt.err (!%p665_p1)
}
  0x21   :  { %41 = dma.hbm_to_vmem [thread:$0]  %s846_s3, 1024, %s36_s16, [#allocation5], %s674_s11, %s674_s11, %s675_s12  }
  0x22   :  { %669 = dma.done.wait [#allocation3], 256  }
  0x23   :  { %670 = vsyncadd [#allocation3], 4294967040 }
  0x24   :  { %671 = dma.done.wait [#allocation5], 1024  }
  0x25   :  { %672 = vsyncadd [#allocation5], 4294966272  ;;  %v677_v0 = vmov 0.0   ;;  %vm678_vm0 = vmmov 0   ;;  %v599_v1 = vld [vmem:[#allocation2] sm:$0xff]   ;;  %v600_v2 = vld [vmem:[#allocation2 + $0x8] sm:$0xff]  }
  0x26   :  { %525 = vmatprep.subr.bf16.mxu0 %v677_v0  ;;  %529 = vmatprep.mubr.msk.bf16.mxu0 %vm678_vm0, %v677_v0  ;;  %v601_v3 = vld [vmem:[%s845_s2] sm:$0xff]   ;;  %vm77_vm1 = vcmask 261120   ;;  %v602_v4 = vld [vmem:[%s845_s2 + $0x8] sm:$0xff]   ;;  %v603_v6 = vld [vmem:[%s845_s2 + $0x10] sm:$0xff]   ;;  %vm456_vm2 = vcmask 31744  }
  0x27   :  { %533 = vmatprep.subr.bf16.mxu1 %v677_v0  ;;  %549 = vmatprep.mubr.msk.bf16.mxu1 %vm678_vm0, %v677_v0  ;;  %v55_v5 = vld [vmem:[%s843_s0] sm:$0xf]  ;;  %v604_v7 = vld [vmem:[%s845_s2 + $0x18] sm:$0xff]   ;;  %v606_v9 = vld [vmem:[%s845_s2 + $0x28] sm:$0xff]  }
  0x28   :  { %526 = vmatpush3.bf16.msra.mxu0 %v599_v1  ;;  %534 = vmatpush3.bf16.msra.mxu1 %v601_v3  ;;  %v605_v8 = vld [vmem:[%s845_s2 + $0x20] sm:$0xff]   ;;  %v607_v10 = vld [vmem:[%s845_s2 + $0x30] sm:$0xff]   ;;  %v608_v11 = vld [vmem:[%s845_s2 + $0x38] sm:$0xff]  }
  0x29   :  { %527 = vmatprep.subr.bf16.mxu0 %v677_v0  ;;  %535 = vmatprep.subr.bf16.mxu1 %v677_v0  ;;  %v609_v12 = vld [vmem:[#allocation4] sm:$0xff]   ;;  %v610_v13 = vld [vmem:[#allocation4 + $0x8] sm:$0xff]   ;;  %v611_v14 = vld [vmem:[#allocation4 + $0x10] sm:$0xff]  }
  0x2a   :  { %v612_v15 = vld [vmem:[#allocation4 + $0x18] sm:$0xff]   ;;  %v613_v16 = vld [vmem:[#allocation4 + $0x20] sm:$0xff]   ;;  %v614_v17 = vld [vmem:[#allocation4 + $0x28] sm:$0xff]  }
  0x2b   :  { %v464_v18 = vld [vmem:[%s848_s5] ss:$0 sm:$0xff]  ;;  %v616_v27 = vld [vmem:[#allocation4 + $0x38] sm:$0xff]   ;;  %v619_v30 = vld [vmem:[%s847_s4 + $0x10] sm:$0xff]  }
  0x2c   :  { %528 = vmatpush3.bf16.msra.mxu0 %v600_v2  ;;  %536 = vmatpush3.bf16.msra.mxu1 %v602_v4  ;;  %v615_v26 = vld [vmem:[#allocation4 + $0x30] sm:$0xff]   ;;  %v618_v29 = vld [vmem:[%s847_s4 + $0x8] sm:$0xff]   ;;  %v620_v31 = vld [vmem:[%s847_s4 + $0x18] sm:$0xff]  }
  0x2d   :  { %553 = vmatprep.subr.bf16.mxu0 %v677_v0  ;;  %537 = vmatprep.subr.bf16.mxu1 %v677_v0  ;;  %v617_v28 = vld [vmem:[%s847_s4] sm:$0xff]   ;;  %v622_v33 = vld [vmem:[%s847_s4 + $0x28] sm:$0xff]   ;;  %v623_v42 = vld [vmem:[%s847_s4 + $0x30] sm:$0xff]  }
  0x2e   :  { %v621_v32 = vld [vmem:[%s847_s4 + $0x20] sm:$0xff]   ;;  %v624_v43 = vld [vmem:[%s847_s4 + $0x38] sm:$0xff]  }
  0x2f   :  { %530 = vmatmul.mubr.msk.bf16.vlgmr.msra.gmra.mrb[0].mxu0 %vm77_vm1, %v55_v5  ;;  %v468_v34 = vld [vmem:[%s848_s5 + $0x1] ss:$0 sm:$0xff]  ;;  %v477_v44 = vld [vmem:[%s848_s5 + $0x2] ss:$0 sm:$0xff]  ;;  %v486_v52 = vld [vmem:[%s849_s6] ss:$0 sm:$0xff] }
  0x30   :  { %569 = vmatprep.mubr.msk.bf16.mxu0 %vm678_vm0, %v677_v0  ;;  %538 = vmatpush3.bf16.msra.mxu1 %v603_v6 }
  0x31   :  { %539 = vmatprep.subr.bf16.mxu1 %v677_v0  ;;  %554 = vmatpush3.bf16.msra.mxu0 %v609_v12 }
  0x32   :  { %555 = vmatprep.subr.bf16.mxu0 %v677_v0 }
  0x34   :  { %540 = vmatpush3.bf16.msra.mxu1 %v604_v7 }
  0x35   :  { %541 = vmatprep.subr.bf16.mxu1 %v677_v0  ;;  %556 = vmatpush3.bf16.msra.mxu0 %v610_v13 }
  0x36   :  { %557 = vmatprep.subr.bf16.mxu0 %v677_v0 }
  0x38   :  { %542 = vmatpush3.bf16.msra.mxu1 %v605_v8 }
  0x39   :  { %543 = vmatprep.subr.bf16.mxu1 %v677_v0  ;;  %558 = vmatpush3.bf16.msra.mxu0 %v611_v14 }
  0x3a   :  { %559 = vmatprep.subr.bf16.mxu0 %v677_v0 }
  0x3c   :  { %544 = vmatpush3.bf16.msra.mxu1 %v606_v9 }
  0x3d   :  { %545 = vmatprep.subr.bf16.mxu1 %v677_v0  ;;  %560 = vmatpush3.bf16.msra.mxu0 %v612_v15 }
  0x3e   :  { %561 = vmatprep.subr.bf16.mxu0 %v677_v0 }
  0x40   :  { %546 = vmatpush3.bf16.msra.mxu1 %v607_v10 }
  0x41   :  { %547 = vmatprep.subr.bf16.mxu1 %v677_v0  ;;  %562 = vmatpush3.bf16.msra.mxu0 %v613_v16 }
  0x42   :  { %563 = vmatprep.subr.bf16.mxu0 %v677_v0 }
  0x44   :  { %548 = vmatpush3.bf16.msra.mxu1 %v608_v11 }
  0x45   :  { %573 = vmatprep.subr.bf16.mxu1 %v677_v0  ;;  %564 = vmatpush3.bf16.msra.mxu0 %v614_v17 }
  0x46   :  { %565 = vmatprep.subr.bf16.mxu0 %v677_v0 }
  0x49   :  { %566 = vmatpush3.bf16.msra.mxu0 %v615_v26 }
  0x4a   :  { %567 = vmatprep.subr.bf16.mxu0 %v677_v0 }
  0x4d   :  { %568 = vmatpush3.bf16.msra.mxu0 %v616_v27 }
 0x102   :  { %v115_v19 = vpop.f32.mrb[0].mxu0 }
 0x103   :  { %v116_v20 = vadd.f32 %v464_v18, %v115_v19  ;;  %v531_v21 = vpop.f32.mrb[1].mxu0 }
 0x104   :  { %v118_v22 = vpop.f32.mrb[2].mxu0 }
 0x105   :  { %v121_v23 = vmax.f32 %v116_v20, 0.0  ;;  %v532_v24 = vpop.f32.mrb[3].mxu0 }
 0x107   :  { %v122_v25 = vpack.c.bf16 %v121_v23, %v121_v23 }
 0x109   :  { %550 = vmatmul.mubr.bf16.vlgmr.msra.gmra.mrb[0].mxu1 %v122_v25 }
 0x10a   :  { %589 = vmatprep.mubr.msk.bf16.mxu1 %vm678_vm0, %v677_v0  ;;  %574 = vmatpush3.bf16.msra.mxu1 %v617_v28 }
 0x10b   :  { %575 = vmatprep.subr.bf16.mxu1 %v677_v0 }
 0x10e   :  { %576 = vmatpush3.bf16.msra.mxu1 %v618_v29 }
 0x10f   :  { %577 = vmatprep.subr.bf16.mxu1 %v677_v0 }
 0x112   :  { %578 = vmatpush3.bf16.msra.mxu1 %v619_v30 }
 0x113   :  { %579 = vmatprep.subr.bf16.mxu1 %v677_v0 }
 0x116   :  { %580 = vmatpush3.bf16.msra.mxu1 %v620_v31 }
 0x117   :  { %581 = vmatprep.subr.bf16.mxu1 %v677_v0 }
 0x11a   :  { %582 = vmatpush3.bf16.msra.mxu1 %v621_v32 }
 0x11b   :  { %583 = vmatprep.subr.bf16.mxu1 %v677_v0 }
 0x11e   :  { %584 = vmatpush3.bf16.msra.mxu1 %v622_v33 }
 0x11f   :  { %585 = vmatprep.subr.bf16.mxu1 %v677_v0 }
 0x122   :  { %586 = vmatpush3.bf16.msra.mxu1 %v623_v42 }
 0x123   :  { %587 = vmatprep.subr.bf16.mxu1 %v677_v0 }
 0x126   :  { %588 = vmatpush3.bf16.msra.mxu1 %v624_v43 }
 0x1dc   :  { %v226_v35 = vpop.f32.mrb[0].mxu1 }
 0x1dd   :  { %v227_v36 = vadd.f32 %v468_v34, %v226_v35  ;;  %v551_v37 = vpop.f32.mrb[1].mxu1 }
 0x1de   :  { %v229_v38 = vpop.f32.mrb[2].mxu1 }
 0x1df   :  { %v232_v39 = vmax.f32 %v227_v36, 0.0  ;;  %v552_v40 = vpop.f32.mrb[3].mxu1 }
 0x1e1   :  { %v233_v41 = vpack.c.bf16 %v232_v39, %v232_v39 }
 0x1e3   :  { %570 = vmatmul.mubr.bf16.vlgmr.msra.gmra.mrb[4].mxu0 %v233_v41 }
 0x2b6   :  { %v337_v45 = vpop.f32.mrb[4].mxu0 }
 0x2b7   :  { %v338_v46 = vadd.f32 %v477_v44, %v337_v45  ;;  %v571_v47 = vpop.f32.mrb[5].mxu0 }
 0x2b8   :  { %v340_v48 = vpop.f32.mrb[6].mxu0 }
 0x2b9   :  { %v343_v49 = vmax.f32 %v338_v46, 0.0  ;;  %v572_v50 = vpop.f32.mrb[7].mxu0 }
 0x2bb   :  { %v344_v51 = vpack.c.bf16 %v343_v49, %v343_v49 }
 0x2bd   :  { %590 = vmatmul.mubr.bf16.vlgmr.msra.gmra.mrb[4].mxu1 %v344_v51 }
 0x390   :  { %v450_v53 = vpop.f32.mrb[4].mxu1 }
 0x391   :  { %v451_v54 = vadd.f32 %v486_v52, %v450_v53  ;;  %v591_v55 = vpop.f32.mrb[5].mxu1 }
 0x392   :  { %v453_v56 = vpop.f32.mrb[6].mxu1 }
 0x393   :  { %457 = vst.msk [vmem:[%s850_s7] sm:$0xff] %vm456_vm2, %v451_v54  ;;  %v592_v57 = vpop.f32.mrb[7].mxu1 }
 0x394   :  { %462 = vsyncpa [#allocation3], 1 }
 0x395   :  { %463 = vsyncpa [#allocation5], 1 }

</bundles_post_ra>
